<compile_context>
chip_gen: v7x
topology: tpu7x:2x2x1
jax: 0.10.0
libtpu: 0.0.40
codegen_flags: <defaults>
</compile_context>

<pallas_src>
import functools

import jax
import jax.numpy as jnp
from jax.experimental import pallas as pl
from jax.experimental.pallas import tpu as pltpu


_N_LIVE_TEMPS = 12          # conservative count of live f32 (block_n, C) temporaries
_MAX_BLOCK_ROWS = 1024      # past ~512-1024 rows/tile there is no HBM-roofline gain


def _vmem_capacity_bytes():
    """Best-effort per-TensorCore VMEM capacity; falls back to v7x's 64 MiB."""
    try:
        cap = getattr(pltpu.get_tpu_info(), "vmem_capacity_bytes", None)
        if cap:
            return int(cap)
    except Exception:
        pass
    return 64 << 20


def _pow_static(base, g):
    """base**g for static g > 0 with EUP-friendly specializations (base > 0 here)."""
    if g == 0.5:
        return jnp.sqrt(base)             # one EUP op instead of exp+log
    if g == 1.0:
        return base
    if g == 2.0:
        return base * base
    return jnp.exp(g * jnp.log(base))


def _make_anchor_loss_kernel(gamma_pos, gamma_neg, slack, n_valid, block_n,
                             acc_rows, needs_mask, hard_targets):
    gamma_pos = float(gamma_pos)
    gamma_neg = float(gamma_neg)
    slack = float(slack)

    def kernel(x_ref, t_ref, out_ref):
        x = x_ref[...].astype(jnp.float32)          # (block_n, C) logits
        C = x.shape[1]

        # ---- one-hot mask of argmax(target, axis=1) --------------------
        if hard_targets:
            # caller guarantees targets are exact one-hot scores
            mask_b = t_ref[...].astype(jnp.float32) > 0.5
        else:
            t = t_ref[...].astype(jnp.float32)
            col = jax.lax.broadcasted_iota(jnp.int32, x.shape, 1)
            row_max = jnp.max(t, axis=1, keepdims=True)
            tgt = jnp.min(jnp.where(t == row_max, col, C), axis=1, keepdims=True)
            mask_b = col == tgt                     # first-occurrence argmax

        # ---- shared transcendental base --------------------------------
        e = jnp.exp(-jnp.abs(x))                    # exp(-|x|) in (0, 1]
        inv_1pe = 1.0 / (1.0 + e)
        # TODO(synk): pl.reciprocal(1+e, approx=True) saves a few VPU ops but drops
        # sigmoid accuracy to ~1e-4 relative; kept exact for the 1e-5 tolerance.
        pt = jnp.where(x >= 0.0, inv_1pe, 1.0 - inv_1pe)        # sigmoid(x)

        # BCEWithLogitsLoss(reduction='none'): max(x,0) - x*y + log1p(exp(-|x|))
        bce = jnp.maximum(x, 0.0) - jnp.where(mask_b, x, 0.0) + jnp.log1p(e)

        # ---- anchor scalings: only the statically-live branch is emitted
        s_pos = None
        s_neg = None
        if gamma_pos != 0.0:
            pt_neg = jnp.max(jnp.where(mask_b, 0.0, pt), axis=1, keepdims=True)
            pt_neg = jnp.minimum(pt_neg + slack, 1.0)
            s_pos = _pow_static(1.0 - pt + pt_neg, gamma_pos)
        if gamma_neg != 0.0:
            pt_pos = jnp.sum(jnp.where(mask_b, pt, 0.0), axis=1, keepdims=True)
            pt_pos = jnp.maximum(pt_pos - slack, 0.0)
            s_neg = _pow_static(1.0 + pt - pt_pos, gamma_neg)

        if s_pos is None and s_neg is None:
            loss = bce
        else:
            sp = jnp.float32(1.0) if s_pos is None else s_pos
            sn = jnp.float32(1.0) if s_neg is None else s_neg
            loss = jnp.where(mask_b, sp, sn) * bce  # mask is 0/1 -> single select

        # ---- mask grid-overhang rows (NaN/Inf-safe select), partial-reduce
        if needs_mask:
            i = pl.program_id(0)
            rows = i * block_n + jax.lax.broadcasted_iota(jnp.int32, (block_n, 1), 0)
            loss = jnp.where(rows < n_valid, loss, 0.0)

        if acc_rows == 8:
            # pure VPU vreg adds; no per-step cross-lane/sublane XLU collapse
            part = jnp.sum(loss.reshape(block_n // 8, 8, C), axis=0)
        else:
            part = jnp.sum(loss, axis=0, keepdims=True)
        out_ref[...] = part.reshape(out_ref.shape)

    return kernel


@functools.partial(
    jax.jit, static_argnames=("gamma", "slack", "anchor", "hard_targets", "block_rows"))
def anchor_loss(logits, targets, *, gamma=0.5, slack=0.05, anchor="neg",
                hard_targets=False, block_rows=None):
    """Pallas implementation of AnchorLoss.forward (no warm-up branch).

    logits:  (N, C) float logits (f32 or bf16)
    targets: (N, C) float class scores; argmax along axis=1 gives the label.
             Set hard_targets=True if they are guaranteed exact one-hot.
    returns: scalar float32 loss
    """
    assert anchor in ("neg", "pos")
    if anchor == "pos":
        gamma_pos, gamma_neg = float(gamma), 0.0
    else:
        gamma_pos, gamma_neg = 0.0, float(gamma)

    N, C = logits.shape
    assert targets.shape == (N, C)

    # --- row-block sizing: dtype- and generation-aware VMEM budget -----------
    c_pad = ((C + 127) // 128) * 128                  # lane padding of the class dim
    in_bytes = jnp.dtype(logits.dtype).itemsize + jnp.dtype(targets.dtype).itemsize
    # 2 pipeline buffers per input + live f32 temporaries inside the kernel body
    per_row_bytes = 2 * in_bytes * c_pad + _N_LIVE_TEMPS * 4 * c_pad
    vmem_cap = _vmem_capacity_bytes()
    budget = max(8 << 20, int(0.45 * vmem_cap))
    bn_cap = max(8, min(_MAX_BLOCK_ROWS, (budget // per_row_bytes) // 8 * 8))
    if block_rows is not None:                        # test/tuning override
        bn_cap = max(8, min(bn_cap, (int(block_rows) // 8) * 8))
    # TODO(synk): for very large C the full-C-per-block assumption should become a
    # second class-tiling grid axis with running max/sum.
    # TODO(synk): lane-dense repacking of several rows per 128-lane register for
    # small C (C <= 64) is not implemented.

    if N <= bn_cap:
        block_n = N                                   # block == full dim, no overhang
    else:
        block_n = bn_cap                              # multiple of 8; last block overhangs
    nb = pl.cdiv(N, block_n)
    acc_rows = 8 if block_n % 8 == 0 else 1
    needs_mask = nb * block_n != N

    kernel = _make_anchor_loss_kernel(gamma_pos, gamma_neg, slack, N, block_n,
                                      acc_rows, needs_mask, hard_targets)

    vmem_needed = per_row_bytes * block_n + (2 << 20)
    vmem_limit = int(min(max(vmem_needed, 16 << 20), int(0.75 * vmem_cap)))

    partials = pl.pallas_call(
        kernel,
        out_shape=jax.ShapeDtypeStruct((nb, acc_rows, C), jnp.float32),
        grid=(nb,),
        in_specs=[
            pl.BlockSpec((block_n, C), lambda i: (i, 0)),
            pl.BlockSpec((block_n, C), lambda i: (i, 0)),
        ],
        out_specs=pl.BlockSpec((1, acc_rows, C), lambda i: (i, 0, 0)),
        compiler_params=pltpu.CompilerParams(
            dimension_semantics=("parallel",),
            vmem_limit_bytes=vmem_limit,
        ),
    )(logits, targets)

    # One tree-reduced collapse outside the kernel; /N gives the per-sample mean
    # of the class-summed loss, matching loss.sum(1).mean() in the module.
    return jnp.sum(partials) / jnp.float32(N)


def anchor_loss_ref(logits, targets, *, gamma=0.5, slack=0.05, anchor="neg"):
    """Pure-JAX reference mirroring the PyTorch module's forward."""
    if anchor == "pos":
        gamma_pos, gamma_neg = float(gamma), 0.0
    else:
        gamma_pos, gamma_neg = 0.0, float(gamma)
    x = logits.astype(jnp.float32)
    t = targets.astype(jnp.float32)
    tgt = jnp.argmax(t, axis=1)
    N, C = x.shape
    mask = jax.nn.one_hot(tgt, C, dtype=jnp.float32)
    pt = jax.nn.sigmoid(x)
    bce = jnp.maximum(x, 0.0) - x * mask + jnp.log1p(jnp.exp(-jnp.abs(x)))
    pt_pos = jnp.take_along_axis(pt, tgt[:, None], axis=1)
    pt_neg = jnp.max(pt * (1.0 - mask), axis=1, keepdims=True)
    pt_neg = jnp.clip(pt_neg + slack, None, 1.0)
    pt_pos = jnp.clip(pt_pos - slack, 0.0, None)
    scaling_pos = jnp.power(1.0 - pt + pt_neg, gamma_pos)
    scaling_neg = jnp.power(1.0 + pt - pt_pos, gamma_neg)
    loss = mask * scaling_pos * bce + (1.0 - mask) * scaling_neg * bce
    return jnp.mean(jnp.sum(loss, axis=1))


if __name__ == "__main__":
    # TODO(synk): warm_up/CrossEntropy branch (epoch < 5) not implemented in-kernel.
    key = jax.random.PRNGKey(0)
    k1, k2, k3, k4 = jax.random.split(key, 4)

    # Test 1: small one-hot targets, (N, C) inputs as the module's forward expects.
    N, C = 8, 16
    logits = jax.random.normal(k1, (N, C), dtype=jnp.float32) * 2.0
    labels = jax.random.randint(k2, (N,), 0, C)
    targets = jax.nn.one_hot(labels, C, dtype=jnp.float32)
    out = jax.block_until_ready(
        anchor_loss(logits, targets, gamma=0.5, slack=0.05, anchor="neg"))
    ref = anchor_loss_ref(logits, targets, gamma=0.5, slack=0.05, anchor="neg")
    assert jnp.allclose(out, ref, rtol=1e-5, atol=1e-5), (out, ref)

    # Test 1b: hard-target fast path (skips the in-kernel argmax machinery).
    out_h = jax.block_until_ready(
        anchor_loss(logits, targets, gamma=0.5, slack=0.05, anchor="neg",
                    hard_targets=True))
    assert jnp.allclose(out_h, ref, rtol=1e-5, atol=1e-5), (out_h, ref)

    # Test 2: N not a multiple of 8, soft targets, 'pos' anchor (exercises the
    # argmax tie-break path and a full-row single block with acc_rows=1).
    N2, C2 = 300, 40
    logits2 = jax.random.normal(k3, (N2, C2), dtype=jnp.float32) * 3.0
    targets2 = jax.random.normal(k4, (N2, C2), dtype=jnp.float32)
    out2 = jax.block_until_ready(
        anchor_loss(logits2, targets2, gamma=0.5, slack=0.05, anchor="pos"))
    ref2 = anchor_loss_ref(logits2, targets2, gamma=0.5, slack=0.05, anchor="pos")
    assert jnp.allclose(out2, ref2, rtol=1e-5, atol=1e-5), (out2, ref2)

    # Test 3: multi-block grid with an overhanging (masked) tail block.
    N4, C4 = 20, 16
    logits4 = jax.random.normal(k1, (N4, C4), dtype=jnp.float32)
    targets4 = jax.random.normal(k2, (N4, C4), dtype=jnp.float32)
    out4 = jax.block_until_ready(
        anchor_loss(logits4, targets4, gamma=0.5, slack=0.05, anchor="neg",
                    block_rows=8))
    ref4 = anchor_loss_ref(logits4, targets4, gamma=0.5, slack=0.05, anchor="neg")
    assert jnp.allclose(out4, ref4, rtol=1e-5, atol=1e-5), (out4, ref4)

    # Test 4: bf16 inputs (halves HBM bytes; kernel upcasts to f32 internally).
    out5 = jax.block_until_ready(
        anchor_loss(logits2.astype(jnp.bfloat16), targets2.astype(jnp.bfloat16),
                    gamma=0.5, slack=0.05, anchor="neg"))
    ref5 = anchor_loss_ref(logits2.astype(jnp.bfloat16).astype(jnp.float32),
                           targets2.astype(jnp.bfloat16).astype(jnp.float32),
                           gamma=0.5, slack=0.05, anchor="neg")
    assert jnp.allclose(out5, ref5, rtol=2e-2, atol=2e-2), (out5, ref5)

    print("KERNEL_OK")
</pallas_src>

<mosaic_0001>
module attributes {stable_mosaic.version = 11 : i64} {
  func.func @kernel(%arg0: i32, %arg1: memref<8x16xf32, #tpu.memory_space<vmem>>, %arg2: memref<8x16xf32, #tpu.memory_space<vmem>>, %arg3: memref<1x8x16xf32, #tpu.memory_space<vmem>>) attributes {dimension_semantics = [#tpu.dimension_semantics<parallel>], iteration_bounds = array<i64: 1>, scalar_prefetch = 0 : i64, scratch_operands = 0 : i64, tpu.core_type = #tpu.core_type<tc>, window_params = [{transform_indices = @transform_0, window_bounds = array<i64: 8, 16>}, {transform_indices = @transform_1, window_bounds = array<i64: 8, 16>}, {transform_indices = @transform_2, window_bounds = array<i64: 1, 8, 16>}]} {
    %c0 = arith.constant 0 : index
    %c0_0 = arith.constant 0 : index
    %0 = vector.load %arg1[%c0, %c0_0] : memref<8x16xf32, #tpu.memory_space<vmem>>, vector<8x16xf32>
    %c0_1 = arith.constant 0 : index
    %c0_2 = arith.constant 0 : index
    %1 = vector.load %arg2[%c0_1, %c0_2] : memref<8x16xf32, #tpu.memory_space<vmem>>, vector<8x16xf32>
    %2 = tpu.iota {dimensions = array<i32: 1>} : vector<8x16xi32>
    %cst = arith.constant dense<0xFF800000> : vector<8xf32>
    %3 = vector.multi_reduction <maximumf>, %1, %cst [1] : vector<8x16xf32> to vector<8xf32>
    %4 = vector.shape_cast %3 : vector<8xf32> to vector<8x1xf32>
    %5 = vector.broadcast %4 : vector<8x1xf32> to vector<8x16xf32>
    %6 = arith.cmpf oeq, %1, %5 : vector<8x16xf32>
    %c16_i32 = arith.constant 16 : i32
    %7 = vector.broadcast %c16_i32 : i32 to vector<8x16xi32>
    %8 = arith.select %6, %2, %7 : vector<8x16xi1>, vector<8x16xi32>
    %cst_3 = arith.constant dense<2147483647> : vector<8xi32>
    %9 = vector.multi_reduction <minsi>, %8, %cst_3 [1] : vector<8x16xi32> to vector<8xi32>
    %10 = vector.shape_cast %9 : vector<8xi32> to vector<8x1xi32>
    %11 = vector.broadcast %10 : vector<8x1xi32> to vector<8x16xi32>
    %12 = arith.cmpi eq, %2, %11 : vector<8x16xi32>
    %13 = math.absf %0 : vector<8x16xf32>
    %cst_4 = arith.constant 0.000000e+00 : f32
    %14 = vector.broadcast %cst_4 : f32 to vector<8x16xf32>
    %15 = arith.subf %14, %13 : vector<8x16xf32>
    %16 = math.exp %15 : vector<8x16xf32>
    %cst_5 = arith.constant 1.000000e+00 : f32
    %17 = vector.broadcast %cst_5 : f32 to vector<8x16xf32>
    %18 = arith.addf %17, %16 : vector<8x16xf32>
    %cst_6 = arith.constant 1.000000e+00 : f32
    %19 = vector.broadcast %cst_6 : f32 to vector<8x16xf32>
    %20 = arith.divf %19, %18 : vector<8x16xf32>
    %cst_7 = arith.constant 0.000000e+00 : f32
    %21 = vector.broadcast %cst_7 : f32 to vector<8x16xf32>
    %22 = arith.cmpf oge, %0, %21 : vector<8x16xf32>
    %cst_8 = arith.constant 1.000000e+00 : f32
    %23 = vector.broadcast %cst_8 : f32 to vector<8x16xf32>
    %24 = arith.subf %23, %20 : vector<8x16xf32>
    %25 = arith.select %22, %20, %24 : vector<8x16xi1>, vector<8x16xf32>
    %cst_9 = arith.constant 0.000000e+00 : f32
    %26 = vector.broadcast %cst_9 : f32 to vector<8x16xf32>
    %27 = arith.maximumf %0, %26 : vector<8x16xf32>
    %cst_10 = arith.constant 0.000000e+00 : f32
    %28 = vector.broadcast %cst_10 : f32 to vector<8x16xf32>
    %29 = arith.select %12, %0, %28 : vector<8x16xi1>, vector<8x16xf32>
    %30 = arith.subf %27, %29 : vector<8x16xf32>
    %31 = math.log1p %16 : vector<8x16xf32>
    %32 = arith.addf %30, %31 : vector<8x16xf32>
    %cst_11 = arith.constant 0.000000e+00 : f32
    %33 = vector.broadcast %cst_11 : f32 to vector<8x16xf32>
    %34 = arith.select %12, %25, %33 : vector<8x16xi1>, vector<8x16xf32>
    %cst_12 = arith.constant dense<0.000000e+00> : vector<8xf32>
    %35 = vector.multi_reduction <add>, %34, %cst_12 [1] : vector<8x16xf32> to vector<8xf32>
    %36 = vector.shape_cast %35 : vector<8xf32> to vector<8x1xf32>
    %cst_13 = arith.constant 5.000000e-02 : f32
    %37 = vector.broadcast %cst_13 : f32 to vector<8x1xf32>
    %38 = arith.subf %36, %37 : vector<8x1xf32>
    %cst_14 = arith.constant 0.000000e+00 : f32
    %39 = vector.broadcast %cst_14 : f32 to vector<8x1xf32>
    %40 = arith.maximumf %38, %39 : vector<8x1xf32>
    %cst_15 = arith.constant 1.000000e+00 : f32
    %41 = vector.broadcast %cst_15 : f32 to vector<8x16xf32>
    %42 = arith.addf %41, %25 : vector<8x16xf32>
    %43 = vector.broadcast %40 : vector<8x1xf32> to vector<8x16xf32>
    %44 = arith.subf %42, %43 : vector<8x16xf32>
    %45 = math.sqrt %44 : vector<8x16xf32>
    %cst_16 = arith.constant 1.000000e+00 : f32
    %46 = vector.broadcast %cst_16 : f32 to vector<8x16xf32>
    %47 = arith.select %12, %46, %45 : vector<8x16xi1>, vector<8x16xf32>
    %48 = arith.mulf %47, %32 : vector<8x16xf32>
    %49 = vector.shape_cast %48 : vector<8x16xf32> to vector<1x8x16xf32>
    %cst_17 = arith.constant dense<0.000000e+00> : vector<8x16xf32>
    %50 = vector.multi_reduction <add>, %49, %cst_17 [0] : vector<1x8x16xf32> to vector<8x16xf32>
    %51 = vector.shape_cast %50 : vector<8x16xf32> to vector<1x8x16xf32>
    %c0_18 = arith.constant 0 : index
    %c0_19 = arith.constant 0 : index
    %c0_20 = arith.constant 0 : index
    %52 = vector.load %arg3[%c0_18, %c0_19, %c0_20] : memref<1x8x16xf32, #tpu.memory_space<vmem>>, vector<1x8x16xf32>
    tpu.vector_store %arg3[%c0_18, %c0_19, %c0_20], %51 {strides = array<i32>} : memref<1x8x16xf32, #tpu.memory_space<vmem>>, vector<1x8x16xf32>,
    return
  }
  func.func @transform_0(%arg0: i32) -> (i32, i32) {
    %c0_i32 = arith.constant 0 : i32
    %c0_i32_0 = arith.constant 0 : i32
    return %arg0, %c0_i32 : i32, i32
  }
  func.func @transform_1(%arg0: i32) -> (i32, i32) {
    %c0_i32 = arith.constant 0 : i32
    %c0_i32_0 = arith.constant 0 : i32
    return %arg0, %c0_i32 : i32, i32
  }
  func.func @transform_2(%arg0: i32) -> (i32, i32, i32) {
    %c0_i32 = arith.constant 0 : i32
    %c0_i32_0 = arith.constant 0 : i32
    %c0_i32_1 = arith.constant 0 : i32
    return %arg0, %c0_i32, %c0_i32_0 : i32, i32, i32
  }
}

</mosaic_0001>

<bundles_post_ra>
// kernel: anchor_loss.1
= control target key start
LH: loop header
LB: loop body
LE: loop exit
PB: predicated region body
PF: predicated region fallthrough
CT: control target
= control target key end

     0   :  { %7 = vsyncpa [#allocation3], 0  ;;  %s225_s0 = inlined_call_operand.hbm [shape: f32[8,16], index: 0, kind: input, shape index: {}]   ;;  %s226_s1 = inlined_call_operand.hbm [shape: f32[8,16], index: 1, kind: input, shape index: {}]   ;;  %s227_s2 = inlined_call_operand.vmem [shape: f32[1,8,16], index: 2, kind: output, shape index: {}]  }
   0x1   :  { %8 = vsyncpa [#allocation5], 0  ;;  %s168_s9 = smov [#allocation2]   ;;  %s169_s11 = smov [#allocation4]  }
   0x2   :  { %s15_s10 = sshll.u32 %s168_s9, 4  ;;  %s25_s12 = sshll.u32 %s169_s11, 4  ;;  %s16_s10 = int_to_ptr.vmem [resolvable:$true] %s15_s10  ;;  %s26_s12 = int_to_ptr.vmem [resolvable:$true] %s25_s12 }
   0x3   :  { %s120_s15 = scalar_lea.hbm %s225_s0, 128 }
   0x4   :  { %p121_p0 = scmp.ne.s32.totalorder %s225_s0, %s120_s15  ;;  %p124_p1 = scmp.lt.u32.totalorder %s120_s15, %s225_s0 }
   0x6   :  { %p126_p2 = pnand %p124_p1, %p121_p0 }
   0x8   :  { %129 = shalt.err (!%p126_p2)
}
   0x9   :  { %s130_s20 = scalar_lea.vmem %s16_s10, 128  ;;  %p135_p4 = scmp.lt.s32.totalorder %s16_s10, %s16_s10 }
   0xa   :  { %p131_p3 = scmp.ne.s32.totalorder %s16_s10, %s130_s20  ;;  %p136_p5 = scmp.lt.s32.totalorder %s130_s20, %s130_s20 }
   0xc   :  { %p137_p6 = por %p136_p5, %p135_p4 }
   0xe   :  { %p138_p7 = pnand %p137_p6, %p131_p3 }
  0x10   :  { %141 = shalt.err (!%p138_p7)
}
  0x11   :  { %18 = dma.hbm_to_vmem [thread:$0]  %s225_s0, 128, %s16_s10, [#allocation3]  }
  0x12   :  { %s142_s25 = scalar_lea.hbm %s226_s1, 128 }
  0x13   :  { %p143_p8 = scmp.ne.s32.totalorder %s226_s1, %s142_s25  ;;  %p146_p9 = scmp.lt.u32.totalorder %s142_s25, %s226_s1 }
  0x15   :  { %p148_p10 = pnand %p146_p9, %p143_p8 }
  0x17   :  { %151 = shalt.err (!%p148_p10)
}
  0x18   :  { %s152_s30 = scalar_lea.vmem %s26_s12, 128  ;;  %p157_p12 = scmp.lt.s32.totalorder %s26_s12, %s26_s12 }
  0x19   :  { %p153_p11 = scmp.ne.s32.totalorder %s26_s12, %s152_s30  ;;  %p158_p13 = scmp.lt.s32.totalorder %s152_s30, %s152_s30 }
  0x1b   :  { %p159_p0 = por %p158_p13, %p157_p12 }
  0x1d   :  { %p160_p1 = pnand %p159_p0, %p153_p11 }
  0x1f   :  { %163 = shalt.err (!%p160_p1)
}
  0x20   :  { %28 = dma.hbm_to_vmem [thread:$0]  %s226_s1, 128, %s26_s12, [#allocation5]  }
  0x21   :  { %164 = dma.done.wait [#allocation3], 128  }
  0x22   :  { %165 = vsyncadd [#allocation3], 4294967168 }
  0x23   :  { %166 = dma.done.wait [#allocation5], 128  }
  0x24   :  { %167 = vsyncadd [#allocation5], 4294967168  ;;  %vm39_vm0 = vcmask 130048   ;;  %v36_v0 = vld [vmem:[#allocation4] sm:$0xff]  ;;  %v37_v2 = vlaneseq  ;;  %v35_v9 = vld [vmem:[#allocation2] sm:$0xff] }
  0x25   :  { %v40_v1 = vsel %vm39_vm0, %v36_v0, -inf  ;;  %v61_v10 = vand.u32 2147483647, %v35_v9  ;;  %vm68_vm4 = vcmp.ge.f32.partialorder %v35_v9, 0.0  ;;  %v71_v42 = vmax.f32 %v35_v9, 0.0 }
  0x26   :  { %41 = vmax.xlane.f32.xlu0 %v40_v1  ;;  %v38_v3 = vand.u32 127, %v37_v2 }
  0x27   :  { %v62_v11 = vsub.f32 0.0, %v61_v10 }
  0x29   :  { %v63_v12 = vmul.f32 1.442695, %v62_v11 }
  0x2b   :  { %112 = vpow2.f32 %v63_v12 }
  0x35   :  { %v113_v17 = vpop.eup %112 }
  0x36   :  { %v65_v18 = vadd.f32 1.0, %v113_v17  ;;  %v77_v19 = vmul.f32 -0.5, %v113_v17  ;;  %v80_v22 = vand.u32 2147483647, %v113_v17 }
  0x38   :  { %114 = vlog2.f32 %v65_v18  ;;  %v78_v20 = vadd.f32 1.0, %v77_v19  ;;  %vm211_vm3 = vcmp.lt.f32.partialorder %v80_v22, 0.0004427343 }
  0x39   :  { %116 = vrcp.f32 %v65_v18 }
  0x3a   :  { %v79_v24 = vmul.f32 %v113_v17, %v78_v20 }
  0x42   :  { %v115_v21 = vpop.eup %114 }
  0x43   :  { %v76_v23 = vmul.f32 0.6931472, %v115_v21  ;;  %v117_v27 = vpop.eup %116 }
  0x44   :  { %v69_v29 = vsub.f32 1.0, %v117_v27 }
  0x45   :  { %v82_v26 = vsel %vm211_vm3, %v79_v24, %v76_v23 }
  0x46   :  { %v70_v34 = vsel %vm68_vm4, %v117_v27, %v69_v29 }
  0x47   :  { %v90_v38 = vadd.f32 1.0, %v70_v34 }
  0xb3   :  { %v42_v4 = vpop.xlane.xlu0 %41 }
  0xb4   :  { %vm43_vm1 = vcmp.eq.f32.partialorder %v36_v0, %v42_v4 }
  0xb5   :  { %v44_v5 = vsel %vm43_vm1, %v38_v3, 16 }
  0xb6   :  { %v45_v6 = vsel %vm39_vm0, %v44_v5, 2147483647 }
  0xb7   :  { %v47_v7 = vshra.s32 %v45_v6, 16  ;;  %v46_v13 = vand.u32 65535, %v45_v6 }
  0xb9   :  { %v49_v8 = vcvt.s32.f32 %v47_v7  ;;  %v48_v15 = vcvt.s32.f32 %v46_v13 }
  0xbb   :  { %50 = vmin.xlane.f32.xlu0 %v49_v8 }
 0x148   :  { %v51_v14 = vpop.xlane.xlu0 %50 }
 0x149   :  { %vm52_vm2 = vcmp.eq.f32.partialorder %v49_v8, %v51_v14  ;;  %v57_v28 = vcvt.f32.s32 %v51_v14 }
 0x14a   :  { %v53_v16 = vsel %vm52_vm2, %v48_v15, inf }
 0x14b   :  { %54 = vmin.xlane.f32.xlu1 %v53_v16  ;;  %v58_v31 = vshll.u32 %v57_v28, 16 }
 0x1d8   :  { %v55_v30 = vpop.xlane.xlu1 %54 }
 0x1d9   :  { %v56_v32 = vcvt.f32.s32 %v55_v30 }
 0x1db   :  { %v59_v33 = vadd.s32 %v58_v31, %v56_v32 }
 0x1dd   :  { %vm60_vm5 = vcmp.eq.s32.totalorder %v38_v3, %v59_v33 }
 0x1de   :  { %v84_v35 = vsel %vm60_vm5, %v70_v34, 0.0  ;;  %v72_v43 = vsel %vm60_vm5, %v35_v9, 0.0 }
 0x1df   :  { %v85_v36 = vsel %vm39_vm0, %v84_v35, 0.0  ;;  %v73_v45 = vsub.f32 %v71_v42, %v72_v43 }
 0x1e0   :  { %86 = vadd.xlane.f32.xlu1 %v85_v36 }
 0x1e1   :  { %v83_v49 = vadd.f32 %v82_v26, %v73_v45 }
 0x26d   :  { %v87_v37 = vpop.xlane.xlu1 %86 }
 0x26e   :  { %v109_v39 = vadd.f32 -0.05, %v87_v37 }
 0x270   :  { %v89_v40 = vmax.f32 %v109_v39, 0.0 }
 0x272   :  { %v91_v41 = vsub.f32 %v90_v38, %v89_v40 }
 0x274   :  { %118 = vrsqrt.f32 %v91_v41  ;;  %vm94_vm6 = vcmp.eq.f32.partialorder %v91_v41, inf  ;;  %v97_v47 = vand.u32 2147483648, %v91_v41  ;;  %vm96_vm7 = vcmp.eq.f32.partialorder %v91_v41, 0.0 }
 0x27e   :  { %v119_v44 = vpop.eup %118 }
 0x27f   :  { %v93_v46 = vmul.f32 %v119_v44, %v91_v41 }
 0x281   :  { %v95_v48 = vsel %vm94_vm6, %v91_v41, %v93_v46 }
 0x282   :  { %v98_v50 = vsel %vm96_vm7, %v97_v47, %v95_v48 }
 0x283   :  { %v99_v51 = vsel %vm60_vm5, 1.0, %v98_v50 }
 0x284   :  { %v100_v52 = vmul.f32 %v99_v51, %v83_v49 }
 0x286   :  { %102 = vst.msk [vmem:[%s227_s2] sm:$0xff] %vm39_vm0, %v100_v52 }
 0x287   :  { %107 = vsyncpa [#allocation3], 1 }
 0x288   :  { %108 = vsyncpa [#allocation5], 1 }

</bundles_post_ra>
